<compile_context>
chip_gen: v7x
topology: tpu7x:2x2x1
jax: 0.10.0
libtpu: 0.0.40
codegen_flags: <defaults>
</compile_context>

<pallas_src>
import math

import numpy as np
import jax
import jax.numpy as jnp
from jax.experimental import pallas as pl

# ----------------------------- config (small, deterministic) -----------------------------
B = 2          # batch
T = 8          # sequence length
C = 32         # n_embd
NH = 4         # n_head
HD = C // NH   # head dim
MULTIPLE_OF = 32
EPS = 1e-5
ROPE_THETA = 10000.0

_hidden = int(2 * (4 * C) / 3)
HIDDEN = MULTIPLE_OF * ((_hidden + MULTIPLE_OF - 1) // MULTIPLE_OF)   # = 96 for C=32

BT = B * T          # 16  rows of the activation slab
BHT = B * NH * T    # 64  rows of the per-(batch,head) key/value expansion
NEG = -1e9          # additive mask value (exp underflows to exactly 0 in f32)


# ----------------------------- constant-slab layout (single input DMA) -----------------------------
def _r8(n):
    return ((n + 7) // 8) * 8


_SEG_SHAPES = [
    ("wqkv", (C, 3 * C)),        # QKV projection, 1/sqrt(HD) folded into q columns
    ("w12", (C, 2 * HIDDEN)),    # packed w1 | w2
    ("w3", (HIDDEN, C)),         # MLP down projection
    ("wo", (C, C)),              # attention output projection
    ("rot", (C, C)),             # block-diagonal rotate-half matrix (NH blocks of (HD,HD))
    ("cos", (BT, C)),            # RoPE cos, tiled over batch and heads
    ("sin", (BT, C)),            # RoPE sin, tiled over batch and heads
    ("ln", (8, C)),              # row 0: ln1 weight, row 1: ln2 weight
    ("gmat", (BHT, BT)),         # per-(batch,head) replication of keys/values (gather via matmul)
    ("hmask", (BHT, C)),         # 1 where column c belongs to that row's head
    ("bias", (BT, BHT)),         # 0 where attention allowed (same batch, causal), NEG otherwise
]
_SEGS = {}
_off = 0
for _name, (_r, _c) in _SEG_SHAPES:
    _SEGS[_name] = (_off, _r, _c)
    _off += _r8(_r)
CONST_ROWS = _off                                     # 408
CONST_COLS = max(shape[1] for _, shape in _SEG_SHAPES)  # 192


# ----------------------------- fused Pallas kernel -----------------------------
def _seg(c_ref, name):
    off, r, c = _SEGS[name]
    return c_ref[off:off + r, 0:c]          # static slice of the constant slab


def _llama_block_kernel(x_ref, c_ref, o_ref):
    f32 = jnp.float32
    x = x_ref[...]                                              # (B*T, C)

    ln = _seg(c_ref, "ln")
    ln1 = ln[0:1, :]
    ln2 = ln[1:2, :]

    # ---- RMSNorm 1 ----
    h = x * jax.lax.rsqrt(jnp.mean(x * x, axis=-1, keepdims=True) + EPS) * ln1

    # ---- fused QKV projection (attention scale pre-folded into q columns) ----
    qkv = jnp.dot(h, _seg(c_ref, "wqkv"), preferred_element_type=f32)      # (B*T, 3C)
    q = qkv[:, 0:C]
    k = qkv[:, C:2 * C]
    v = qkv[:, 2 * C:3 * C]

    # ---- RoPE on whole q/k slabs: x*cos + (x @ block-diag rotate-half)*sin ----
    cos = _seg(c_ref, "cos")
    sin = _seg(c_ref, "sin")
    rot = _seg(c_ref, "rot")
    q = q * cos + jnp.dot(q, rot, preferred_element_type=f32) * sin
    k = k * cos + jnp.dot(k, rot, preferred_element_type=f32) * sin

    # ---- all-batch all-head causal attention via block-diagonal masking (no reshapes) ----
    gmat = _seg(c_ref, "gmat")                                  # (B*NH*T, B*T)
    hmask = _seg(c_ref, "hmask")                                # (B*NH*T, C)
    bias = _seg(c_ref, "bias")                                  # (B*T, B*NH*T)
    k2 = jnp.dot(gmat, k, preferred_element_type=f32) * hmask   # (B*NH*T, C)
    v2 = jnp.dot(gmat, v, preferred_element_type=f32) * hmask   # (B*NH*T, C)
    # scores: contract last dims (q @ K2^T on the MXU, no explicit transpose)
    s = jax.lax.dot_general(q, k2, (((1,), (1,)), ((), ())),
                            preferred_element_type=f32) + bias  # (B*T, B*NH*T)
    s = s - jnp.max(s, axis=-1, keepdims=True)                  # shift-invariant per head block
    p = jnp.exp(s)                                              # masked entries -> exactly 0
    num = jnp.dot(p, v2, preferred_element_type=f32)            # (B*T, C)  head-merged numerator
    den = jnp.dot(p, hmask, preferred_element_type=f32)         # (B*T, C)  per-head denominators
    y = num / den                                               # softmax normalization

    # ---- attention output projection + residual ----
    x1 = x + jnp.dot(y, _seg(c_ref, "wo"), preferred_element_type=f32)

    # ---- RMSNorm 2 ----
    h2 = x1 * jax.lax.rsqrt(jnp.mean(x1 * x1, axis=-1, keepdims=True) + EPS) * ln2

    # ---- SwiGLU MLP (packed w1|w2 -> one matmul) + residual ----
    h12 = jnp.dot(h2, _seg(c_ref, "w12"), preferred_element_type=f32)      # (B*T, 2*HIDDEN)
    h1 = h12[:, 0:HIDDEN]
    hg = h12[:, HIDDEN:2 * HIDDEN]
    m = h1 * jax.nn.sigmoid(h1) * hg
    o_ref[...] = x1 + jnp.dot(m, _seg(c_ref, "w3"), preferred_element_type=f32)


# ----------------------------- one-time constant preparation (off the hot path) -------------
def _rope_tables_np(t, d, theta=ROPE_THETA):
    inv_freq = 1.0 / (theta ** (np.arange(0, d, 2, dtype=np.float32) / d))   # (d/2,)
    pos = np.arange(t, dtype=np.float32)
    freqs = pos[:, None] * inv_freq[None, :]
    freqs = np.repeat(freqs, 2, axis=-1)                                     # (T, d) interleaved
    return np.cos(freqs).astype(np.float32), np.sin(freqs).astype(np.float32)


def _rotate_half_matrix_np(d):
    # (x @ P)[i] = -x[i+1] for even i, +x[i-1] for odd i  (interleaved rotate_half)
    p = np.zeros((d, d), np.float32)
    for i in range(0, d, 2):
        p[i + 1, i] = -1.0
        p[i, i + 1] = 1.0
    return p


def prepare_constants(params):
    """Build the single f32 constant slab once (numpy, no per-call JAX work)."""
    wqkv = np.array(params["w_qkv"], np.float32)
    wqkv[:, :C] *= 1.0 / math.sqrt(HD)                        # fold attention scale into Wq
    w12 = np.concatenate([np.array(params["w1"], np.float32),
                          np.array(params["w2"], np.float32)], axis=1)
    w3 = np.array(params["w3"], np.float32)
    wo = np.array(params["w_o"], np.float32)

    cos_hd, sin_hd = _rope_tables_np(T, HD)
    cosb = np.tile(cos_hd, (B, NH))                           # (B*T, C)
    sinb = np.tile(sin_hd, (B, NH))
    rot = np.kron(np.eye(NH, dtype=np.float32), _rotate_half_matrix_np(HD))   # (C, C)

    ln = np.zeros((8, C), np.float32)
    ln[0] = np.array(params["ln1_w"], np.float32)
    ln[1] = np.array(params["ln2_w"], np.float32)

    gmat = np.zeros((BHT, BT), np.float32)
    hmask = np.zeros((BHT, C), np.float32)
    bias = np.full((BT, BHT), NEG, np.float32)
    for b in range(B):
        for h in range(NH):
            for j in range(T):
                r = b * NH * T + h * T + j
                gmat[r, b * T + j] = 1.0
                hmask[r, h * HD:(h + 1) * HD] = 1.0
                for i in range(j, T):                        # causal: key j attends to query i >= j
                    bias[b * T + i, r] = 0.0

    slab = np.zeros((CONST_ROWS, CONST_COLS), np.float32)
    for name, arr in [("wqkv", wqkv), ("w12", w12), ("w3", w3), ("wo", wo),
                      ("rot", rot), ("cos", cosb), ("sin", sinb), ("ln", ln),
                      ("gmat", gmat), ("hmask", hmask), ("bias", bias)]:
        off, r, c = _SEGS[name]
        assert arr.shape == (r, c), (name, arr.shape, (r, c))
        slab[off:off + r, :c] = arr
    return jnp.asarray(slab)


# ----------------------------- wrapper -----------------------------
@jax.jit
def llama_block(x, const_slab):
    # x: (B, T, C) float32; const_slab: (CONST_ROWS, CONST_COLS) float32 (from prepare_constants)
    b, t, c = x.shape
    out = pl.pallas_call(
        _llama_block_kernel,
        out_shape=jax.ShapeDtypeStruct((b * t, c), jnp.float32),
    )(x.reshape(b * t, c), const_slab)
    return out.reshape(b, t, c)


# ----------------------------- pure-JAX reference -----------------------------
def apply_rotary(x, theta=ROPE_THETA):
    # x: (B, NH, T, D) — interleaved-pair rotation over the full head dim.
    b, h, t, d = x.shape
    inv_freq = 1.0 / (theta ** (jnp.arange(0, d, 2, dtype=jnp.float32) / d))
    pos = jnp.arange(t, dtype=jnp.float32)
    freqs = pos[:, None] * inv_freq[None, :]
    freqs = jnp.repeat(freqs, 2, axis=-1)
    cos = jnp.cos(freqs)
    sin = jnp.sin(freqs)
    x1 = x[..., 0::2]
    x2 = x[..., 1::2]
    x_rot = jnp.stack([-x2, x1], axis=-1).reshape(x.shape)
    return x * cos + x_rot * sin


def llama_block_ref(x, params):
    b, t, c = x.shape

    def rms(u, w):
        return u * jax.lax.rsqrt(jnp.mean(u * u, axis=-1, keepdims=True) + EPS) * w

    h = rms(x, params["ln1_w"])
    qkv = h @ params["w_qkv"]
    q, k, v = jnp.split(qkv, 3, axis=-1)

    def to_heads(u):
        return u.reshape(b, t, NH, HD).transpose(0, 2, 1, 3)

    q, k, v = to_heads(q), to_heads(k), to_heads(v)
    q = apply_rotary(q)
    k = apply_rotary(k)
    s = jnp.einsum("bhqd,bhkd->bhqk", q, k) / math.sqrt(HD)
    mask = jnp.tril(jnp.ones((t, t), dtype=bool))
    s = jnp.where(mask, s, -jnp.inf)
    a = jax.nn.softmax(s, axis=-1)
    y = jnp.einsum("bhqk,bhkd->bhqd", a, v)
    y = y.transpose(0, 2, 1, 3).reshape(b, t, c)
    x = x + y @ params["w_o"]

    h2 = rms(x, params["ln2_w"])
    h1 = h2 @ params["w1"]
    hh = (h1 * jax.nn.sigmoid(h1)) * (h2 @ params["w2"])
    return x + hh @ params["w3"]


# ----------------------------- main -----------------------------
if __name__ == "__main__":
    key = jax.random.PRNGKey(0)
    ks = jax.random.split(key, 9)

    def init(k, shape, fan_in):
        bound = 1.0 / math.sqrt(fan_in)
        return jax.random.uniform(k, shape, jnp.float32, -bound, bound)

    params = {
        "ln1_w": 1.0 + 0.02 * jax.random.normal(ks[0], (C,), jnp.float32),
        "w_qkv": init(ks[1], (C, 3 * C), C),
        "w_o":   init(ks[2], (C, C), C),
        "ln2_w": 1.0 + 0.02 * jax.random.normal(ks[3], (C,), jnp.float32),
        "w1":    init(ks[4], (C, HIDDEN), C),
        "w2":    init(ks[5], (C, HIDDEN), C),
        "w3":    init(ks[6], (HIDDEN, C), HIDDEN),
    }

    x = jax.random.normal(ks[7], (B, T, C), jnp.float32)

    const_slab = prepare_constants(params)          # built once, off the hot path

    out = jax.block_until_ready(llama_block(x, const_slab))
    ref = jax.block_until_ready(llama_block_ref(x, params))

    assert out.shape == (B, T, C)
    assert jnp.allclose(out, ref, rtol=1e-4, atol=1e-4), "mismatch vs pure-JAX reference"

    print("KERNEL_OK")
</pallas_src>

<mosaic_0001>
module attributes {stable_mosaic.version = 11 : i64} {
  func.func @_llama_block_kernel(%arg0: memref<16x32xf32, #tpu.memory_space<vmem>>, %arg1: memref<408x192xf32, #tpu.memory_space<vmem>>, %arg2: memref<16x32xf32, #tpu.memory_space<vmem>>) attributes {dimension_semantics = [], scalar_prefetch = 0 : i64, scratch_operands = 0 : i64, tpu.core_type = #tpu.core_type<tc>} {
    %c0 = arith.constant 0 : index
    %c0_0 = arith.constant 0 : index
    %0 = vector.load %arg0[%c0, %c0_0] : memref<16x32xf32, #tpu.memory_space<vmem>>, vector<16x32xf32>
    %c256 = arith.constant 256 : index
    %c0_1 = arith.constant 0 : index
    %1 = vector.load %arg1[%c256, %c0_1] : memref<408x192xf32, #tpu.memory_space<vmem>>, vector<8x32xf32>
    %2 = vector.extract_strided_slice %1 {offsets = [0, 0], sizes = [1, 32], strides = [1, 1]} : vector<8x32xf32> to vector<1x32xf32>
    %3 = vector.extract_strided_slice %1 {offsets = [1, 0], sizes = [1, 32], strides = [1, 1]} : vector<8x32xf32> to vector<1x32xf32>
    %4 = arith.mulf %0, %0 : vector<16x32xf32>
    %cst = arith.constant dense<0.000000e+00> : vector<16xf32>
    %5 = vector.multi_reduction <add>, %4, %cst [1] : vector<16x32xf32> to vector<16xf32>
    %6 = vector.shape_cast %5 : vector<16xf32> to vector<16x1xf32>
    %cst_2 = arith.constant 3.200000e+01 : f32
    %7 = vector.broadcast %cst_2 : f32 to vector<16x1xf32>
    %8 = arith.divf %6, %7 : vector<16x1xf32>
    %cst_3 = arith.constant 9.99999974E-6 : f32
    %9 = vector.broadcast %cst_3 : f32 to vector<16x1xf32>
    %10 = arith.addf %8, %9 : vector<16x1xf32>
    %11 = math.rsqrt %10 : vector<16x1xf32>
    %12 = vector.broadcast %11 : vector<16x1xf32> to vector<16x32xf32>
    %13 = arith.mulf %0, %12 : vector<16x32xf32>
    %14 = vector.broadcast %2 : vector<1x32xf32> to vector<16x32xf32>
    %15 = arith.mulf %13, %14 : vector<16x32xf32>
    %c0_4 = arith.constant 0 : index
    %c0_5 = arith.constant 0 : index
    %16 = vector.load %arg1[%c0_4, %c0_5] : memref<408x192xf32, #tpu.memory_space<vmem>>, vector<32x96xf32>
    %cst_6 = arith.constant dense<0.000000e+00> : vector<16x96xf32>
    %17 = tpu.matmul %15, %16, %cst_6 {dimension_numbers = #tpu.dot_dimension_numbers<[1], [0], [0], [1], [0, 0, 1, 1], [], []>} : vector<16x32xf32>, vector<32x96xf32>, vector<16x96xf32> -> vector<16x96xf32>
    %18 = vector.extract_strided_slice %17 {offsets = [0, 0], sizes = [16, 32], strides = [1, 1]} : vector<16x96xf32> to vector<16x32xf32>
    %19 = vector.extract_strided_slice %17 {offsets = [0, 32], sizes = [16, 32], strides = [1, 1]} : vector<16x96xf32> to vector<16x32xf32>
    %20 = vector.extract_strided_slice %17 {offsets = [0, 64], sizes = [16, 32], strides = [1, 1]} : vector<16x96xf32> to vector<16x32xf32>
    %c224 = arith.constant 224 : index
    %c0_7 = arith.constant 0 : index
    %21 = vector.load %arg1[%c224, %c0_7] : memref<408x192xf32, #tpu.memory_space<vmem>>, vector<16x32xf32>
    %c240 = arith.constant 240 : index
    %c0_8 = arith.constant 0 : index
    %22 = vector.load %arg1[%c240, %c0_8] : memref<408x192xf32, #tpu.memory_space<vmem>>, vector<16x32xf32>
    %c192 = arith.constant 192 : index
    %c0_9 = arith.constant 0 : index
    %23 = vector.load %arg1[%c192, %c0_9] : memref<408x192xf32, #tpu.memory_space<vmem>>, vector<32x32xf32>
    %24 = arith.mulf %18, %21 : vector<16x32xf32>
    %cst_10 = arith.constant dense<0.000000e+00> : vector<16x32xf32>
    %25 = tpu.matmul %18, %23, %cst_10 {dimension_numbers = #tpu.dot_dimension_numbers<[1], [0], [0], [1], [0, 0, 1, 1], [], []>} : vector<16x32xf32>, vector<32x32xf32>, vector<16x32xf32> -> vector<16x32xf32>
    %26 = arith.mulf %25, %22 : vector<16x32xf32>
    %27 = arith.addf %24, %26 : vector<16x32xf32>
    %28 = arith.mulf %19, %21 : vector<16x32xf32>
    %cst_11 = arith.constant dense<0.000000e+00> : vector<16x32xf32>
    %29 = tpu.matmul %19, %23, %cst_11 {dimension_numbers = #tpu.dot_dimension_numbers<[1], [0], [0], [1], [0, 0, 1, 1], [], []>} : vector<16x32xf32>, vector<32x32xf32>, vector<16x32xf32> -> vector<16x32xf32>
    %30 = arith.mulf %29, %22 : vector<16x32xf32>
    %31 = arith.addf %28, %30 : vector<16x32xf32>
    %c264 = arith.constant 264 : index
    %c0_12 = arith.constant 0 : index
    %32 = vector.load %arg1[%c264, %c0_12] : memref<408x192xf32, #tpu.memory_space<vmem>>, vector<64x16xf32>
    %c328 = arith.constant 328 : index
    %c0_13 = arith.constant 0 : index
    %33 = vector.load %arg1[%c328, %c0_13] : memref<408x192xf32, #tpu.memory_space<vmem>>, vector<64x32xf32>
    %c392 = arith.constant 392 : index
    %c0_14 = arith.constant 0 : index
    %34 = vector.load %arg1[%c392, %c0_14] : memref<408x192xf32, #tpu.memory_space<vmem>>, vector<16x64xf32>
    %cst_15 = arith.constant dense<0.000000e+00> : vector<64x32xf32>
    %35 = tpu.matmul %32, %31, %cst_15 {dimension_numbers = #tpu.dot_dimension_numbers<[1], [0], [0], [1], [0, 0, 1, 1], [], []>} : vector<64x16xf32>, vector<16x32xf32>, vector<64x32xf32> -> vector<64x32xf32>
    %36 = arith.mulf %35, %33 : vector<64x32xf32>
    %cst_16 = arith.constant dense<0.000000e+00> : vector<64x32xf32>
    %37 = tpu.matmul %32, %20, %cst_16 {dimension_numbers = #tpu.dot_dimension_numbers<[1], [0], [0], [1], [0, 0, 1, 1], [], []>} : vector<64x16xf32>, vector<16x32xf32>, vector<64x32xf32> -> vector<64x32xf32>
    %38 = arith.mulf %37, %33 : vector<64x32xf32>
    %cst_17 = arith.constant dense<0.000000e+00> : vector<16x64xf32>
    %39 = tpu.matmul %27, %36, %cst_17 {dimension_numbers = #tpu.dot_dimension_numbers<[1], [1], [0], [0], [0, 0, 1, 0], [], []>} : vector<16x32xf32>, vector<64x32xf32>, vector<16x64xf32> -> vector<16x64xf32>
    %40 = arith.addf %39, %34 : vector<16x64xf32>
    %cst_18 = arith.constant dense<0xFF800000> : vector<16xf32>
    %41 = vector.multi_reduction <maximumf>, %40, %cst_18 [1] : vector<16x64xf32> to vector<16xf32>
    %42 = vector.shape_cast %41 : vector<16xf32> to vector<16x1xf32>
    %43 = vector.broadcast %42 : vector<16x1xf32> to vector<16x64xf32>
    %44 = arith.subf %40, %43 : vector<16x64xf32>
    %45 = math.exp %44 : vector<16x64xf32>
    %cst_19 = arith.constant dense<0.000000e+00> : vector<16x32xf32>
    %46 = tpu.matmul %45, %38, %cst_19 {dimension_numbers = #tpu.dot_dimension_numbers<[1], [0], [0], [1], [0, 0, 1, 1], [], []>} : vector<16x64xf32>, vector<64x32xf32>, vector<16x32xf32> -> vector<16x32xf32>
    %cst_20 = arith.constant dense<0.000000e+00> : vector<16x32xf32>
    %47 = tpu.matmul %45, %33, %cst_20 {dimension_numbers = #tpu.dot_dimension_numbers<[1], [0], [0], [1], [0, 0, 1, 1], [], []>} : vector<16x64xf32>, vector<64x32xf32>, vector<16x32xf32> -> vector<16x32xf32>
    %48 = arith.divf %46, %47 : vector<16x32xf32>
    %c160 = arith.constant 160 : index
    %c0_21 = arith.constant 0 : index
    %49 = vector.load %arg1[%c160, %c0_21] : memref<408x192xf32, #tpu.memory_space<vmem>>, vector<32x32xf32>
    %cst_22 = arith.constant dense<0.000000e+00> : vector<16x32xf32>
    %50 = tpu.matmul %48, %49, %cst_22 {dimension_numbers = #tpu.dot_dimension_numbers<[1], [0], [0], [1], [0, 0, 1, 1], [], []>} : vector<16x32xf32>, vector<32x32xf32>, vector<16x32xf32> -> vector<16x32xf32>
    %51 = arith.addf %0, %50 : vector<16x32xf32>
    %52 = arith.mulf %51, %51 : vector<16x32xf32>
    %cst_23 = arith.constant dense<0.000000e+00> : vector<16xf32>
    %53 = vector.multi_reduction <add>, %52, %cst_23 [1] : vector<16x32xf32> to vector<16xf32>
    %54 = vector.shape_cast %53 : vector<16xf32> to vector<16x1xf32>
    %cst_24 = arith.constant 3.200000e+01 : f32
    %55 = vector.broadcast %cst_24 : f32 to vector<16x1xf32>
    %56 = arith.divf %54, %55 : vector<16x1xf32>
    %cst_25 = arith.constant 9.99999974E-6 : f32
    %57 = vector.broadcast %cst_25 : f32 to vector<16x1xf32>
    %58 = arith.addf %56, %57 : vector<16x1xf32>
    %59 = math.rsqrt %58 : vector<16x1xf32>
    %60 = vector.broadcast %59 : vector<16x1xf32> to vector<16x32xf32>
    %61 = arith.mulf %51, %60 : vector<16x32xf32>
    %62 = vector.broadcast %3 : vector<1x32xf32> to vector<16x32xf32>
    %63 = arith.mulf %61, %62 : vector<16x32xf32>
    %c32 = arith.constant 32 : index
    %c0_26 = arith.constant 0 : index
    %64 = vector.load %arg1[%c32, %c0_26] : memref<408x192xf32, #tpu.memory_space<vmem>>, vector<32x192xf32>
    %cst_27 = arith.constant dense<0.000000e+00> : vector<16x192xf32>
    %65 = tpu.matmul %63, %64, %cst_27 {dimension_numbers = #tpu.dot_dimension_numbers<[1], [0], [0], [1], [0, 0, 1, 1], [], []>} : vector<16x32xf32>, vector<32x192xf32>, vector<16x192xf32> -> vector<16x192xf32>
    %66 = vector.extract_strided_slice %65 {offsets = [0, 0], sizes = [16, 96], strides = [1, 1]} : vector<16x192xf32> to vector<16x96xf32>
    %67 = vector.extract_strided_slice %65 {offsets = [0, 96], sizes = [16, 96], strides = [1, 1]} : vector<16x192xf32> to vector<16x96xf32>
    %68 = arith.negf %66 : vector<16x96xf32>
    %69 = math.exp %68 : vector<16x96xf32>
    %cst_28 = arith.constant 1.000000e+00 : f32
    %70 = vector.broadcast %cst_28 : f32 to vector<16x96xf32>
    %71 = arith.addf %70, %69 : vector<16x96xf32>
    %72 = arith.divf %70, %71 : vector<16x96xf32>
    %73 = arith.mulf %66, %72 : vector<16x96xf32>
    %74 = arith.mulf %73, %67 : vector<16x96xf32>
    %c64 = arith.constant 64 : index
    %c0_29 = arith.constant 0 : index
    %75 = vector.load %arg1[%c64, %c0_29] : memref<408x192xf32, #tpu.memory_space<vmem>>, vector<96x32xf32>
    %cst_30 = arith.constant dense<0.000000e+00> : vector<16x32xf32>
    %76 = tpu.matmul %74, %75, %cst_30 {dimension_numbers = #tpu.dot_dimension_numbers<[1], [0], [0], [1], [0, 0, 1, 1], [], []>} : vector<16x96xf32>, vector<96x32xf32>, vector<16x32xf32> -> vector<16x32xf32>
    %77 = arith.addf %51, %76 : vector<16x32xf32>
    %c0_31 = arith.constant 0 : index
    %c0_32 = arith.constant 0 : index
    %78 = vector.load %arg2[%c0_31, %c0_32] : memref<16x32xf32, #tpu.memory_space<vmem>>, vector<16x32xf32>
    tpu.vector_store %arg2[%c0_31, %c0_32], %77 {strides = array<i32>} : memref<16x32xf32, #tpu.memory_space<vmem>>, vector<16x32xf32>,
    return
  }
}

</mosaic_0001>

<bundles_post_ra>
// kernel: llama_block.1
= control target key start
LH: loop header
LB: loop body
LE: loop exit
PB: predicated region body
PF: predicated region fallthrough
CT: control target
= control target key end

     0   :  { %vm17_vm0 = vcmask 261120   ;;  %s2067_s0 = inlined_call_operand.vmem [shape: f32[16,32], index: 0, kind: input, shape index: {}]   ;;  %s2068_s1 = inlined_call_operand.vmem [shape: f32[408,192], index: 1, kind: input, shape index: {}]   ;;  %s2069_s2 = inlined_call_operand.hbm [shape: f32[16,32], index: 2, kind: output, shape index: {}]  }
   0x1   :  { %v1741_v0 = vld [vmem:[%s2067_s0] sm:$0xff]  ;;  %v1746_v1 = vld [vmem:[%s2067_s0 + $0x8] sm:$0xff] }
   0x2   :  { %7 = vsyncpa [#allocation3], 0  ;;  %v15_v2 = vmul.f32 %v1741_v0, %v1741_v0  ;;  %v16_v3 = vmul.f32 %v1746_v1, %v1746_v1  ;;  %v39_v6 = vld [vmem:[%s2068_s1] sm:$0xff]  ;;  %v40_v7 = vld [vmem:[%s2068_s1 + $0x10] sm:$0xff]  ;;  %v33_v12 = vlaneseq  ;;  %s1716_s28 = smov 32   ;;  %s1717_s7 = smov 96  }
   0x3   :  { %v41_v8 = vld [vmem:[%s2068_s1 + $0x20] sm:$0xff]  ;;  %v1523_v9 = vpack.c.bf16 %v40_v7, %v39_v6  ;;  %v42_v10 = vld [vmem:[%s2068_s1 + $0x30] sm:$0xff]  ;;  %vm350_vm1 = vcmask 130048   ;;  %s1718_s14 = smov 64   ;;  %vm1872_vm2 = vmpackc.low %vm17_vm0, %vm17_vm0  ;;  %vm712_vm3 = vcmask 523264   ;;  %vm1129_vm4 = vcmask 785408  }
   0x4   :  { %v18_v4 = vsel %vm17_vm0, %v15_v2, 0.0  ;;  %v21_v5 = vsel %vm17_vm0, %v16_v3, 0.0  ;;  %v1527_v11 = vpack.c.bf16 %v42_v10, %v41_v8  ;;  %v34_v13 = vshrl.u32 %v33_v12, 7  ;;  %v14_v15 = vld [vmem:[%s2068_s1 + $0x200] sm:$0xff]  ;;  %v129_v19 = vld [vmem:[%s2068_s1 + $0x190] sm:$0xff] }
   0x5   :  { %19 = vadd.xlane.f32.xlu0 %v18_v4  ;;  %1524 = vmatprep.subr.bf16.mxu0 %v1523_v9  ;;  %v124_v17 = vld [vmem:[%s2068_s1 + $0x1c0] sm:$0xff]  ;;  %v131_v34 = vld [vmem:[%s2068_s1 + $0x1b0] sm:$0xff] }
   0x6   :  { %1526 = vmatpush3.bf16.msra.mxu0 %v1523_v9  ;;  %v990_v14 = vsub.s32 1, %v34_v13  ;;  %v128_v18 = vld [vmem:[%s2068_s1 + $0x180] sm:$0xff]  ;;  %v35_v27 = vsub.s32 0, %v34_v13  ;;  %v125_v38 = vld [vmem:[%s2068_s1 + $0x1d0] sm:$0xff] }
   0x7   :  { %1528 = vmatprep.subr.bf16.mxu0 %v1527_v11  ;;  %v1531_v20 = vpack.c.bf16 %v129_v19, %v128_v18  ;;  %v130_v33 = vld [vmem:[%s2068_s1 + $0x1a0] sm:$0xff]  ;;  %v127_v45 = vld [vmem:[%s2068_s1 + $0x1f0] sm:$0xff] }
   0x8   :  { %v1769_v16 = vrot.slane %v14_v15, %v990_v14  ;;  %v36_v28 = vrot.slane %v14_v15, %v35_v27  ;;  %v1535_v37 = vpack.c.bf16 %v131_v34, %v130_v33  ;;  %v126_v46 = vld [vmem:[%s2068_s1 + $0x1e0] sm:$0xff]  ;;  %v324_v61 = vld [vmem:[%s2068_s1 + $0x210] sm:$0xff] }
   0x9   :  { %22 = vadd.xlane.f32.xlu0 %v21_v5  ;;  %1400 = vmatprep.mubr.msk.f32.mxu1 %vm350_vm1, %v324_v61  ;;  %v325_v13 = vld [vmem:[%s2068_s1 + $0x220] sm:$0xff]  ;;  %v326_v15 = vld [vmem:[%s2068_s1 + $0x230] sm:$0xff] }
   0xa   :  { %1530 = vmatpush3.bf16.msra.mxu0 %v1527_v11  ;;  %v328_v18 = vld [vmem:[%s2068_s1 + $0x250] sm:$0xff]  ;;  %v329_v19 = vld [vmem:[%s2068_s1 + $0x260] sm:$0xff] }
   0xb   :  { %1532 = vmatprep.subr.bf16.mxu0 %v1531_v20 }
  0x1f   :  { %221 = vrot.lane.b32.xlu0 %v124_v17, %s1716_s28 }
  0x92   :  { %v20_v21 = vpop.xlane.xlu0 %19 }
  0x93   :  { %v25_v22 = vmul.f32 0.03125, %v20_v21  ;;  %v331_v21 = vld [vmem:[%s2068_s1 + $0x280] sm:$0xff] }
  0x95   :  { %v27_v23 = vadd.f32 1e-05, %v25_v22  ;;  %v1856_v22 = vld [vmem:[%s2068_s1 + $0x2a0] sm:$0xff] }
  0x96   :  { %v23_v24 = vpop.xlane.xlu0 %22 }
  0x97   :  { %1668 = vrsqrt.f32 %v27_v23  ;;  %v26_v25 = vmul.f32 0.03125, %v23_v24  ;;  %v1861_v23 = vld [vmem:[%s2068_s1 + $0x290] sm:$0xff] }
  0x99   :  { %v28_v26 = vadd.f32 1e-05, %v26_v25 }
  0x9a   :  { %v222_v59 = vpop.permute.xlu0 %221 }
  0x9b   :  { %1670 = vrsqrt.f32 %v28_v26 }
  0xa1   :  { %v1669_v29 = vpop.eup %1668 }
  0xa2   :  { %v31_v30 = vmul.f32 %v1669_v29, %v1741_v0 }
  0xa4   :  { %v37_v31 = vmul.f32 %v36_v28, %v31_v30  ;;  %v1879_v30 = vld [vmem:[%s2068_s1 + $0x2b0] sm:$0xff] }
  0xa5   :  { %v1671_v32 = vpop.eup %1670 }
  0xa6   :  { %v32_v35 = vmul.f32 %v1671_v32, %v1746_v1  ;;  %1371 = vmatprep.mubr.msk.f32.mxu0 %vm17_vm0, %v37_v31 }
  0xa8   :  { %v38_v36 = vmul.f32 %v36_v28, %v32_v35  ;;  %v1868_v28 = vld [vmem:[%s2068_s1 + $0x2c0] sm:$0xff] }
  0xa9   :  { %v1599_v29 = vpack.c.bf16 %v1868_v28, %v1879_v30 }
  0xaa   :  { %1372 = vmatmul.mubr.msk.f32.vlgmr.msra.gmra.mrb[0].mxu0 %vm17_vm0, %v38_v36  ;;  %v1888_v36 = vld [vmem:[%s2068_s1 + $0x2e0] sm:$0xff] }
  0xab   :  { %1534 = vmatpush3.bf16.msra.mxu0 %v1531_v20 }
  0xac   :  { %1536 = vmatprep.subr.bf16.mxu0 %v1535_v37 }
  0xaf   :  { %1538 = vmatpush3.bf16.msra.mxu0 %v1535_v37 }
  0xb0   :  { %1540 = vmatprep.subr.bf16.mxu0 %v1531_v20 }
 0x17d   :  { %v1373_v39 = vpop.f32.mrb[0].mxu0 }
 0x17e   :  { %v115_v40 = vpop.f32.mrb[1].mxu0  ;;  %v133_v41 = vmul.f32 %v1373_v39, %v125_v38 }
 0x17f   :  { %229 = vrot.lane.b32.xlu1 %v115_v40, %s1717_s7  ;;  %1382 = vmatprep.mubr.msk.f32.mxu0 %vm17_vm0, %v115_v40  ;;  %v1663_v42 = vpack.i.bf16 %v1373_v39, %v115_v40  ;;  %v132_v50 = vmul.f32 %v124_v17, %v115_v40  ;;  %v227_v62 = vmul.f32 %v222_v59, %v115_v40  ;;  %v327_v17 = vld [vmem:[%s2068_s1 + $0x240] sm:$0xff] }
 0x180   :  { %1383 = vmatmul.mubr.msk.f32.vlgmr.msra.gmra.mrb[2].mxu0 %vm17_vm0, %v1373_v39 }
 0x181   :  { %1542 = vmatpush3.bf16.msra.mxu0 %v1531_v20  ;;  %v330_v20 = vld [vmem:[%s2068_s1 + $0x270] sm:$0xff] }
 0x182   :  { %1544 = vmatprep.subr.bf16.mxu0 %v1535_v37 }
 0x183   :  { %231 = vrot.lane.b32.xlu1 %v1373_v39, %s1717_s7 }
 0x185   :  { %1546 = vmatpush3.bf16.msra.mxu0 %v1535_v37  ;;  %v1895_v37 = vld [vmem:[%s2068_s1 + $0x2d0] sm:$0xff] }
 0x187   :  { %223 = vrot.lane.b32.xlu1 %v125_v38, %s1716_s28 }
 0x1f1   :  { %v230_v43 = vpop.permute.xlu1 %229 }
 0x1f2   :  { %1393 = vmatprep.mubr.msk.f32.mxu0 %vm17_vm0, %v230_v43  ;;  %v1904_v43 = vld [vmem:[%s2068_s1 + $0x300] sm:$0xff] }
 0x1f5   :  { %v232_v44 = vpop.permute.xlu1 %231 }
 0x1f6   :  { %1394 = vmatmul.mubr.msk.f32.vlgmr.msra.gmra.mrb[4].mxu0 %vm17_vm0, %v232_v44  ;;  %v1909_v44 = vld [vmem:[%s2068_s1 + $0x2f0] sm:$0xff] }
 0x1f7   :  { %1416 = vmatprep.mubr.msk.f32.mxu0 %vm350_vm1, %v324_v61 }
 0x1f9   :  { %v224_v58 = vpop.permute.xlu1 %223 }
 0x1fa   :  { %v228_v63 = vmul.f32 %v1373_v39, %v224_v58 }
 0x253   :  { %v1384_v47 = vpop.f32.mrb[2].mxu0 }
 0x254   :  { %v216_v48 = vmul.f32 %v1384_v47, %v127_v45  ;;  %v206_v49 = vpop.f32.mrb[3].mxu0 }
 0x255   :  { %v215_v51 = vmul.f32 %v206_v49, %v126_v46 }
 0x256   :  { %v1807_v52 = vadd.f32 %v216_v48, %v133_v41 }
 0x257   :  { %v217_v53 = vadd.f32 %v215_v51, %v132_v50 }
 0x2c9   :  { %v1395_v54 = vpop.f32.mrb[4].mxu0 }
 0x2ca   :  { %v303_v55 = vpop.f32.mrb[5].mxu0  ;;  %v313_v57 = vmul.f32 %v1395_v54, %v127_v45 }
 0x2cb   :  { %v312_v56 = vmul.f32 %v303_v55, %v126_v46 }
 0x2cd   :  { %316 = vrot.lane.b32.xlu1 %v312_v56, %s1716_s28 }
 0x2d1   :  { %318 = vrot.lane.b32.xlu1 %v313_v57, %s1716_s28 }
 0x33f   :  { %v317_v60 = vpop.permute.xlu1 %316 }
 0x340   :  { %v322_v3 = vadd.f32 %v317_v60, %v227_v62  ;;  %v340_v62 = vld [vmem:[%s2068_s1 + $0x310] sm:$0xff] }
 0x343   :  { %v319_v2 = vpop.permute.xlu1 %318 }
 0x344   :  { %v323_v4 = vadd.f32 %v319_v2, %v228_v63 }
 0x346   :  { %v1658_v5 = vpack.i.bf16 %v323_v4, %v322_v3 }
 0x348   :  { %1659 = vrot.lane.b32.xlu1 %v1658_v5, %s1717_s7 }
 0x34c   :  { %1664 = vrot.lane.b32.xlu1 %v1663_v42, %s1718_s14 }
 0x3ba   :  { %v1660_v6 = vpop.permute.xlu1 %1659 }
 0x3bb   :  { %v1662_v7 = vunpack.i.h.bf16 %v1660_v6  ;;  %v1661_v8 = vunpack.i.l.bf16 %v1660_v6 }
 0x3bd   :  { %v1547_v9 = vpack.c.bf16 %v1662_v7, %v1661_v8 }
 0x3be   :  { %v1665_v10 = vpop.permute.xlu1 %1664 }
 0x3bf   :  { %v1667_v11 = vunpack.i.h.bf16 %v1665_v10  ;;  %v1666_v12 = vunpack.i.l.bf16 %v1665_v10  ;;  %1548 = vmatprep.subr.bf16.mxu1 %v1547_v9 }
 0x3c0   :  { %1550 = vmatpush3.bf16.msra.mxu1 %v1547_v9 }
 0x3c1   :  { %v1551_v14 = vpack.c.bf16 %v1667_v11, %v1666_v12 }
 0x3c3   :  { %1401 = vmatmul.mubr.msk.f32.vlgmr.msra.gmra.mrb[0].mxu1 %vm350_vm1, %v325_v13  ;;  %1552 = vmatprep.subr.bf16.mxu0 %v1551_v14 }
 0x3c4   :  { %1554 = vmatpush3.bf16.msra.mxu0 %v1551_v14  ;;  %1403 = vmatprep.mubr.msk.f32.mxu1 %vm350_vm1, %v326_v15 }
 0x3c7   :  { %1404 = vmatmul.mubr.msk.f32.gmra.mrb[2].mxu1 %vm350_vm1, %v327_v17  ;;  %1417 = vmatmul.mubr.msk.f32.vlgmr.msra.gmra.mrb[6].mxu0 %vm350_vm1, %v325_v13 }
 0x3c8   :  { %1406 = vmatprep.mubr.msk.f32.mxu1 %vm350_vm1, %v328_v18  ;;  %1419 = vmatprep.mubr.msk.f32.mxu0 %vm350_vm1, %v326_v15 }
 0x3cb   :  { %1407 = vmatmul.mubr.msk.f32.gmra.mrb[4].mxu1 %vm350_vm1, %v329_v19  ;;  %1420 = vmatmul.mubr.msk.f32.gmra.mrb[8].mxu0 %vm350_vm1, %v327_v17 }
 0x3cc   :  { %1409 = vmatprep.mubr.msk.f32.mxu1 %vm350_vm1, %v330_v20  ;;  %1422 = vmatprep.mubr.msk.f32.mxu0 %vm350_vm1, %v328_v18  ;;  %v1595_v18 = vpack.c.bf16 %v1856_v22, %v1861_v23 }
 0x3cf   :  { %1410 = vmatmul.mubr.msk.f32.gmra.mrb[6].mxu1 %vm350_vm1, %v331_v21  ;;  %1423 = vmatmul.mubr.msk.f32.gmra.mrb[10].mxu0 %vm350_vm1, %v329_v19 }
 0x3d0   :  { %1444 = vmatprep.mubr.msk.f32.mxu1 %vm17_vm0, %v217_v53  ;;  %1425 = vmatprep.mubr.msk.f32.mxu0 %vm350_vm1, %v330_v20 }
 0x3d3   :  { %1426 = vmatmul.mubr.msk.f32.gmra.mrb[12].mxu0 %vm350_vm1, %v331_v21 }
 0x496   :  { %v1402_v24 = vpop.f32.mrb[0].mxu1 }
 0x497   :  { %v481_v25 = vmul.f32 %v1402_v24, %v1856_v22  ;;  %v441_v26 = vpop.f32.mrb[1].mxu1 }
 0x498   :  { %v480_v27 = vmul.f32 %v441_v26, %v1861_v23 }
 0x49a   :  { %v1555_v31 = vpack.c.bf16 %v481_v25, %v480_v27  ;;  %v1405_v32 = vpop.f32.mrb[2].mxu1  ;;  %v1418_v51 = vpop.f32.mrb[6].mxu0 }
 0x49b   :  { %v483_v33 = vmul.f32 %v1405_v32, %v1868_v28  ;;  %v451_v34 = vpop.f32.mrb[3].mxu1  ;;  %v600_v53 = vmul.f32 %v1418_v51, %v1856_v22  ;;  %v560_v54 = vpop.f32.mrb[7].mxu0  ;;  %v1603_v22 = vpack.c.bf16 %v1888_v36, %v1895_v37 }
 0x49c   :  { %1557 = vmatprep.subr.msk.bf16.mxu1 %vm1872_vm2, %v1555_v31  ;;  %v482_v35 = vmul.f32 %v451_v34, %v1879_v30  ;;  %v599_v55 = vmul.f32 %v560_v54, %v1861_v23  ;;  %v1607_v23 = vpack.c.bf16 %v1904_v43, %v1909_v44  ;;  %v888_v34 = vld [vmem:[%s2068_s1 + $0x170] sm:$0xff]  ;;  %v994_v54 = vld [vmem:[%s2068_s1 + $0x40] sm:$0xff] }
 0x49d   :  { %1560 = vmatpush3.bf16.xpose.msk.msra.mxu1 %vm1872_vm2, %v1555_v31 }
 0x49e   :  { %v1561_v38 = vpack.c.bf16 %v483_v33, %v482_v35  ;;  %v1408_v39 = vpop.f32.mrb[4].mxu1  ;;  %v1421_v56 = vpop.f32.mrb[8].mxu0  ;;  %v1579_v59 = vpack.c.bf16 %v600_v53, %v599_v55  ;;  %v887_v33 = vld [vmem:[%s2068_s1 + $0x160] sm:$0xff]  ;;  %v996_v55 = vld [vmem:[%s2068_s1 + $0x50] sm:$0xff] }
 0x49f   :  { %v485_v40 = vmul.f32 %v1408_v39, %v1888_v36  ;;  %v461_v41 = vpop.f32.mrb[5].mxu1  ;;  %v602_v57 = vmul.f32 %v1421_v56, %v1868_v28  ;;  %v570_v58 = vpop.f32.mrb[9].mxu0  ;;  %v885_v28 = vld [vmem:[%s2068_s1 + $0x140] sm:$0xff]  ;;  %v1615_v35 = vpack.c.bf16 %v888_v34, %v887_v33  ;;  %v1621_v56 = vpack.c.bf16 %v996_v55, %v994_v54 }
 0x4a0   :  { %1563 = vmatprep.subr.msk.bf16.mxu1 %vm1872_vm2, %v1561_v38  ;;  %v484_v42 = vmul.f32 %v461_v41, %v1895_v37  ;;  %v601_v60 = vmul.f32 %v570_v58, %v1879_v30  ;;  %1580 = vmatprep.subr.bf16.mxu0 %v1579_v59  ;;  %v886_v30 = vld [vmem:[%s2068_s1 + $0x150] sm:$0xff]  ;;  %v1001_v58 = vld [vmem:[%s2068_s1 + $0x78] sm:$0xff] }
 0x4a1   :  { %1582 = vmatpush3.bf16.msra.mxu0 %v1579_v59  ;;  %v1611_v32 = vpack.c.bf16 %v886_v30, %v885_v28 }
 0x4a2   :  { %v1567_v45 = vpack.c.bf16 %v485_v40, %v484_v42  ;;  %v1411_v46 = vpop.f32.mrb[6].mxu1  ;;  %v1583_v61 = vpack.c.bf16 %v602_v57, %v601_v60  ;;  %v1424_v7 = vpop.f32.mrb[10].mxu0  ;;  %v999_v57 = vld [vmem:[%s2068_s1 + $0x68] sm:$0xff]  ;;  %v998_v60 = vld [vmem:[%s2068_s1 + $0x60] sm:$0xff] }
 0x4a3   :  { %v487_v47 = vmul.f32 %v1411_v46, %v1904_v43  ;;  %v471_v48 = vpop.f32.mrb[7].mxu1  ;;  %v580_v8 = vpop.f32.mrb[11].mxu0  ;;  %v604_v9 = vmul.f32 %v1424_v7, %v1888_v36  ;;  %v1623_v59 = vpack.c.bf16 %v1001_v58, %v999_v57 }
 0x4a4   :  { %v486_v49 = vmul.f32 %v471_v48, %v1909_v44  ;;  %1584 = vmatprep.subr.bf16.mxu0 %v1583_v61  ;;  %v603_v10 = vmul.f32 %v580_v8, %v1895_v37 }
 0x4a5   :  { %1566 = vmatpush3.bf16.xpose.msk.msra.mxu1 %vm1872_vm2, %v1561_v38  ;;  %1586 = vmatpush3.bf16.msra.mxu0 %v1583_v61  ;;  %v1000_v61 = vld [vmem:[%s2068_s1 + $0x70] sm:$0xff] }
 0x4a6   :  { %1569 = vmatprep.subr.msk.bf16.mxu1 %vm1872_vm2, %v1567_v45  ;;  %v1573_v50 = vpack.c.bf16 %v487_v47, %v486_v49  ;;  %v1587_v11 = vpack.c.bf16 %v604_v9, %v603_v10  ;;  %v1427_v12 = vpop.f32.mrb[12].mxu0 }
 0x4a7   :  { %v606_v13 = vmul.f32 %v1427_v12, %v1904_v43  ;;  %v590_v14 = vpop.f32.mrb[13].mxu0 }
 0x4a8   :  { %v605_v15 = vmul.f32 %v590_v14, %v1909_v44  ;;  %1588 = vmatprep.subr.bf16.mxu0 %v1587_v11  ;;  %v1118_v14 = vld [vmem:[%s2068_s1 + $0x90] sm:$0xff] }
 0x4a9   :  { %1590 = vmatpush3.bf16.msra.mxu0 %v1587_v11 }
 0x4aa   :  { %v1591_v17 = vpack.c.bf16 %v606_v13, %v605_v15  ;;  %v1117_v13 = vld [vmem:[%s2068_s1 + $0x80] sm:$0xff] }
 0x4ab   :  { %v1119_v15 = vld [vmem:[%s2068_s1 + $0xa0] sm:$0xff] }
 0x4ac   :  { %1592 = vmatprep.subr.bf16.mxu0 %v1591_v17 }
 0x4ad   :  { %1572 = vmatpush3.bf16.xpose.msk.msra.mxu1 %vm1872_vm2, %v1567_v45  ;;  %1594 = vmatpush3.bf16.msra.mxu0 %v1591_v17  ;;  %v1627_v17 = vpack.c.bf16 %v1118_v14, %v1117_v13 }
 0x4ae   :  { %1575 = vmatprep.subr.msk.bf16.mxu1 %vm1872_vm2, %v1573_v50  ;;  %1596 = vmatprep.subr.bf16.mxu0 %v1595_v18 }
 0x4b5   :  { %1578 = vmatpush3.bf16.xpose.msk.msra.mxu1 %vm1872_vm2, %v1573_v50 }
 0x4b6   :  { %1612 = vmatprep.subr.bf16.mxu1 %v1611_v32 }
 0x4bc   :  { %1445 = vmatmul.mubr.msk.f32.vlgmr.msra.gmra.mrb[8].mxu1 %vm17_vm0, %v1807_v52  ;;  %v341_v52 = vld [vmem:[%s2068_s1 + $0x320] sm:$0xff] }
 0x4bd   :  { %1614 = vmatpush3.bf16.msra.mxu1 %v1611_v32 }
 0x4be   :  { %1616 = vmatprep.subr.bf16.mxu1 %v1615_v35 }
 0x4c1   :  { %1618 = vmatpush3.bf16.msra.mxu1 %v1615_v35 }
 0x4c2   :  { %1628 = vmatprep.subr.bf16.mxu1 %v1627_v17 }
 0x58f   :  { %v1446_v63 = vpop.f32.mrb[8].mxu1 }
 0x590   :  { %v709_v2 = vadd.f32 %v1446_v63, %v341_v52  ;;  %v703_v3 = vpop.f32.mrb[9].mxu1  ;;  %v1625_v52 = vpack.c.bf16 %v1000_v61, %v998_v60 }
 0x591   :  { %v704_v4 = vadd.f32 %v703_v3, %v340_v62  ;;  %v1719_v62 = vmov 0.0  }
 0x592   :  { %v716_v5 = vsel %vm712_vm3, %v709_v2, -inf }
 0x593   :  { %717 = vmax.xlane.f32.xlu0 %v716_v5  ;;  %v713_v6 = vsel %vm712_vm3, %v704_v4, -inf }
 0x594   :  { %714 = vmax.xlane.f32.xlu1 %v713_v6 }
 0x620   :  { %v718_v19 = vpop.xlane.xlu0 %717 }
 0x621   :  { %v720_v20 = vsub.f32 %v709_v2, %v718_v19  ;;  %v715_v21 = vpop.xlane.xlu1 %714  ;;  %v1121_v19 = vld [vmem:[%s2068_s1 + $0xc0] sm:$0xff] }
 0x622   :  { %v719_v24 = vsub.f32 %v704_v4, %v715_v21 }
 0x623   :  { %v723_v25 = vmul.f32 1.442695, %v720_v20  ;;  %v1122_v20 = vld [vmem:[%s2068_s1 + $0xd0] sm:$0xff] }
 0x624   :  { %v721_v26 = vmul.f32 1.442695, %v719_v24  ;;  %v1635_v21 = vpack.c.bf16 %v1122_v20, %v1121_v19  ;;  %v1123_v24 = vld [vmem:[%s2068_s1 + $0xe0] sm:$0xff] }
 0x626   :  { %1672 = vpow2.f32 %v721_v26 }
 0x627   :  { %1674 = vpow2.f32 %v723_v25  ;;  %v1124_v25 = vld [vmem:[%s2068_s1 + $0xf0] sm:$0xff] }
 0x628   :  { %v1639_v26 = vpack.c.bf16 %v1124_v25, %v1123_v24 }
 0x630   :  { %v1673_v27 = vpop.eup %1672 }
 0x631   :  { %v1675_v31 = vpop.eup %1674  ;;  %1463 = vmatprep.mubr.msk.f32.mxu0 %vm712_vm3, %v1673_v27 }
 0x632   :  { %1464 = vmatmul.mubr.msk.f32.vlgmr.msra.gmra.mrb[14].mxu0 %vm712_vm3, %v1675_v31 }
 0x633   :  { %1598 = vmatpush3.bf16.msra.mxu0 %v1595_v18  ;;  %1482 = vmatprep.mubr.msk.f32.mxu0 %vm712_vm3, %v1673_v27  ;;  %v1120_v18 = vld [vmem:[%s2068_s1 + $0xb0] sm:$0xff]  ;;  %v1125_v27 = vld [vmem:[%s2068_s1 + $0x100] sm:$0xff] }
 0x634   :  { %1600 = vmatprep.subr.bf16.mxu0 %v1599_v29 }
 0x637   :  { %1602 = vmatpush3.bf16.msra.mxu0 %v1599_v29  ;;  %v1126_v29 = vld [vmem:[%s2068_s1 + $0x110] sm:$0xff] }
 0x638   :  { %1604 = vmatprep.subr.bf16.mxu0 %v1603_v22 }
 0x63b   :  { %1606 = vmatpush3.bf16.msra.mxu0 %v1603_v22  ;;  %v1127_v22 = vld [vmem:[%s2068_s1 + $0x120] sm:$0xff] }
 0x63c   :  { %1608 = vmatprep.subr.bf16.mxu0 %v1607_v23 }
 0x63f   :  { %1610 = vmatpush3.bf16.msra.mxu0 %v1607_v23  ;;  %v1128_v23 = vld [vmem:[%s2068_s1 + $0x130] sm:$0xff] }
 0x640   :  { %v1647_v28 = vpack.c.bf16 %v1128_v23, %v1127_v22 }
 0x642   :  { %1483 = vmatmul.mubr.msk.f32.vlgmr.msra.gmra.mrb[16].mxu0 %vm712_vm3, %v1675_v31  ;;  %v1643_v31 = vpack.c.bf16 %v1126_v29, %v1125_v27 }
 0x643   :  { %1072 = vmatprep.mubr.f32.mxu0 %v1719_v62 }
 0x705   :  { %v1465_v36 = vpop.f32.mrb[14].mxu0 }
 0x706   :  { %v797_v37 = vpop.f32.mrb[15].mxu0 }
 0x715   :  { %v1484_v38 = vpop.f32.mrb[16].mxu0 }
 0x716   :  { %1676 = vrcp.f32 %v1484_v38  ;;  %v872_v39 = vpop.f32.mrb[17].mxu0 }
 0x717   :  { %1678 = vrcp.f32 %v872_v39 }
 0x720   :  { %v1677_v40 = vpop.eup %1676 }
 0x721   :  { %v1679_v41 = vpop.eup %1678  ;;  %v884_v42 = vmul.f32 %v1677_v40, %v1465_v36 }
 0x722   :  { %v882_v43 = vmul.f32 %v1679_v41, %v797_v37 }
 0x724   :  { %1493 = vmatprep.mubr.msk.f32.mxu1 %vm17_vm0, %v882_v43 }
 0x725   :  { %1494 = vmatmul.mubr.msk.f32.vlgmr.msra.gmra.mrb[10].mxu1 %vm17_vm0, %v884_v42 }
 0x726   :  { %1630 = vmatpush3.bf16.msra.mxu1 %v1627_v17 }
 0x7f8   :  { %v1495_v44 = vpop.f32.mrb[10].mxu1 }
 0x7f9   :  { %v1968_v45 = vadd.f32 %v1495_v44, %v1746_v1  ;;  %v961_v46 = vpop.f32.mrb[11].mxu1  ;;  %v995_v1 = vld [vmem:[%s2068_s1 + $0x48] sm:$0xff] }
 0x7fa   :  { %v1971_v47 = vadd.f32 %v961_v46, %v1741_v0  ;;  %v997_v0 = vld [vmem:[%s2068_s1 + $0x58] sm:$0xff]  ;;  %s1720_s1 = smov [#allocation2]  }
 0x7fb   :  { %v973_v48 = vmul.f32 %v1968_v45, %v1968_v45  ;;  %v1619_v53 = vpack.c.bf16 %v997_v0, %v995_v1 }
 0x7fc   :  { %v972_v49 = vmul.f32 %v1971_v47, %v1971_v47 }
 0x7fd   :  { %v977_v50 = vsel %vm17_vm0, %v973_v48, 0.0  ;;  %1620 = vmatprep.subr.bf16.mxu0 %v1619_v53 }
 0x7fe   :  { %978 = vadd.xlane.f32.xlu1 %v977_v50  ;;  %v974_v51 = vsel %vm17_vm0, %v972_v49, 0.0  ;;  %1622 = vmatpush1.bf16.msra.mxu0 %v1621_v56 }
 0x7ff   :  { %975 = vadd.xlane.f32.xlu0 %v974_v51  ;;  %1624 = vmatprep.subr.bf16.mxu0 %v1623_v59 }
 0x802   :  { %1626 = vmatpush1.bf16.msra.mxu0 %v1625_v52 }
 0x88b   :  { %v979_v63 = vpop.xlane.xlu1 %978 }
 0x88c   :  { %v981_v2 = vmul.f32 0.03125, %v979_v63  ;;  %v976_v3 = vpop.xlane.xlu0 %975 }
 0x88d   :  { %v980_v4 = vmul.f32 0.03125, %v976_v3 }
 0x88e   :  { %v983_v5 = vadd.f32 1e-05, %v981_v2 }
 0x88f   :  { %v982_v6 = vadd.f32 1e-05, %v980_v4 }
 0x890   :  { %1680 = vrsqrt.f32 %v983_v5 }
 0x891   :  { %1682 = vrsqrt.f32 %v982_v6 }
 0x89a   :  { %v1681_v7 = vpop.eup %1680 }
 0x89b   :  { %v1683_v8 = vpop.eup %1682  ;;  %v987_v11 = vmul.f32 %v1681_v7, %v1968_v45 }
 0x89c   :  { %v986_v9 = vmul.f32 %v1683_v8, %v1971_v47 }
 0x89d   :  { %v993_v12 = vmul.f32 %v1769_v16, %v987_v11 }
 0x89e   :  { %v992_v10 = vmul.f32 %v1769_v16, %v986_v9  ;;  %v1631_v16 = vpack.c.bf16 %v1120_v18, %v1119_v15 }
 0x8a0   :  { %1269 = vmatmul.mubr.msk.f32.vlgmr.msra.gmra.mrb[18].mxu0 %vm17_vm0, %v992_v10  ;;  %1632 = vmatprep.subr.bf16.mxu1 %v1631_v16 }
 0x8a1   :  { %1078 = vmatprep.mubr.f32.mxu0 %v1719_v62  ;;  %1634 = vmatpush3.bf16.msra.mxu1 %v1631_v16 }
 0x8a2   :  { %1636 = vmatprep.subr.bf16.mxu1 %v1635_v21 }
 0x8a4   :  { %1270 = vmatmul.mubr.msk.f32.gmra.mrb[20].mxu0 %vm17_vm0, %v993_v12 }
 0x8a5   :  { %1638 = vmatpush3.bf16.msra.mxu1 %v1635_v21 }
 0x8a6   :  { %1640 = vmatprep.subr.bf16.mxu1 %v1639_v26 }
 0x8a9   :  { %1642 = vmatpush3.bf16.msra.mxu1 %v1639_v26 }
 0x8aa   :  { %1644 = vmatprep.subr.bf16.mxu1 %v1643_v31 }
 0x8ad   :  { %1646 = vmatpush3.bf16.msra.mxu1 %v1643_v31 }
 0x8ae   :  { %1648 = vmatprep.subr.bf16.mxu1 %v1647_v28 }
 0x8b1   :  { %1650 = vmatpush3.bf16.msra.mxu1 %v1647_v28 }
 0x973   :  { %v1074_v30 = vpop.f32.mrb[18].mxu0 }
 0x974   :  { %1103 = vrot.lane.b32.xlu0 %v1074_v30, %s1716_s28  ;;  %v1076_v32 = vpop.f32.mrb[19].mxu0  ;;  %v1271_v35 = vmul.f32 -1.442695, %v1074_v30 }
 0x975   :  { %1105 = vrot.lane.b32.xlu1 %v1076_v32, %s1716_s28 }
 0x976   :  { %1684 = vpow2.f32 %v1271_v35 }
 0x977   :  { %v1080_v33 = vpop.f32.mrb[20].mxu0 }
 0x978   :  { %v1082_v34 = vpop.f32.mrb[21].mxu0  ;;  %v1272_v36 = vmul.f32 -1.442695, %v1080_v33 }
 0x979   :  { %1107 = vrot.lane.b32.xlu1 %v1080_v33, %s1716_s28  ;;  %1109 = vrot.lane.b32.xlu0 %v1082_v34, %s1716_s28  ;;  %s1220_s28 = sshll.u32 %s1720_s1, 4  ;;  %s1221_s28 = int_to_ptr.vmem [resolvable:$true] %s1220_s28 }
 0x97a   :  { %1686 = vpow2.f32 %v1272_v36  ;;  %s1692_s13 = scalar_lea.vmem %s1221_s28, 256  ;;  %p1697_p1 = scmp.lt.s32.totalorder %s1221_s28, %s1221_s28 }
 0x97b   :  { %p1693_p0 = scmp.ne.s32.totalorder %s1221_s28, %s1692_s13  ;;  %p1698_p2 = scmp.lt.s32.totalorder %s1692_s13, %s1692_s13 }
 0x97d   :  { %p1699_p3 = por %p1698_p2, %p1697_p1 }
 0x97f   :  { %p1700_p4 = pnand %p1699_p3, %p1693_p0 }
 0x980   :  { %v1685_v37 = vpop.eup %1684 }
 0x981   :  { %v1091_v38 = vadd.f32 1.0, %v1685_v37 }
 0x983   :  { %1688 = vrcp.f32 %v1091_v38 }
 0x984   :  { %v1687_v39 = vpop.eup %1686 }
 0x985   :  { %v1092_v40 = vadd.f32 1.0, %v1687_v39 }
 0x987   :  { %1690 = vrcp.f32 %v1092_v40 }
 0x98d   :  { %v1689_v41 = vpop.eup %1688 }
 0x98e   :  { %v1097_v43 = vmul.f32 %v1689_v41, %v1074_v30 }
 0x991   :  { %v1691_v46 = vpop.eup %1690 }
 0x992   :  { %v1098_v50 = vmul.f32 %v1691_v46, %v1080_v33 }
 0x9e6   :  { %v1104_v42 = vpop.permute.xlu0 %1103 }
 0x9e7   :  { %v1106_v44 = vpop.permute.xlu1 %1105 }
 0x9e8   :  { %v1111_v48 = vsel %vm17_vm0, %v1104_v42, %v1106_v44 }
 0x9e9   :  { %v1115_v49 = vmul.f32 %v1111_v48, %v1097_v43 }
 0x9eb   :  { %1520 = vmatprep.mubr.msk.f32.mxu1 %vm1129_vm4, %v1115_v49  ;;  %v1108_v51 = vpop.permute.xlu1 %1107  ;;  %v1110_v1 = vpop.permute.xlu0 %1109 }
 0x9ec   :  { %v1112_v0 = vsel %vm17_vm0, %v1108_v51, %v1110_v1 }
 0x9ed   :  { %v1116_v53 = vmul.f32 %v1112_v0, %v1098_v50 }
 0x9ef   :  { %1521 = vmatmul.mubr.msk.f32.vlgmr.msra.gmra.mrb[12].mxu1 %vm1129_vm4, %v1116_v53 }
 0xac2   :  { %v1522_v54 = vpop.f32.mrb[12].mxu1 }
 0xac3   :  { %v1212_v55 = vadd.f32 %v1522_v54, %v1968_v45  ;;  %v1202_v56 = vpop.f32.mrb[13].mxu1 }
 0xac4   :  { %v1211_v57 = vadd.f32 %v1202_v56, %v1971_v47 }
 0xac5   :  { %1214 = vst.msk [vmem:[#allocation2 + $0x8] sm:$0xff] %vm17_vm0, %v1212_v55 }
 0xac6   :  { %1213 = vst.msk [vmem:[#allocation2] sm:$0xff] %vm17_vm0, %v1211_v57 }
 0xac7   :  { %1703 = shalt.err (!%p1700_p4)
}
 0xac8   :  { %s1704_s0 = scalar_lea.hbm %s2069_s2, 256 }
 0xac9   :  { %p1705_p5 = scmp.ne.s32.totalorder %s2069_s2, %s1704_s0  ;;  %p1708_p6 = scmp.lt.u32.totalorder %s1704_s0, %s2069_s2 }
 0xacb   :  { %p1710_p7 = pnand %p1708_p6, %p1705_p5 }
 0xacd   :  { %1713 = shalt.err (!%p1710_p7)
}
 0xace   :  { %s1721_s20 = smov 128   ;;  %s1722_s21 = smov 8  }
 0xacf   :  { %1226 = dma.vmem_to_hbm [thread:$0]  %s1221_s28, 256, %s2069_s2, [#allocation3], %s1721_s20, %s1721_s20, %s1722_s21  }
 0xad0   :  { %1714 = dma.done.wait [#allocation3], 256  }
 0xad1   :  { %1715 = vsyncadd [#allocation3], 4294967040 }
 0xad2   :  { %1230 = vsyncpa [#allocation3], 1 }

</bundles_post_ra>
